<compile_context>
chip_gen: v7x
topology: tpu7x:2x2x1
jax: 0.10.0
libtpu: 0.0.40
codegen_flags: <defaults>
</compile_context>

<pallas_src>
import numpy as np
import jax
import jax.numpy as jnp
from jax.experimental import pallas as pl
from jax.experimental.pallas import tpu as pltpu


def _round_up(x, m):
    return ((x + m - 1) // m) * m


# ----------------------------------------------------------------------------
# Pallas kernel wrapper: weighted NLL, batch axis tiled, partial sums per tile
# ----------------------------------------------------------------------------
def dsl_loss_pallas(pred, gt, w, *, max_block_bytes=4 * 1024 * 1024):
    """loss = sum_i w_i * (logsumexp(x_i) - x[i, gt_i]) / B, hot path in Pallas.

    pred: (B, C) f32 or bf16 logits; gt: (B,) int; w: (B,) f32 per-sample weights.
    """
    B, C = pred.shape
    itemsize = jnp.dtype(pred.dtype).itemsize

    # ---- batch-tile selection with lane-padded byte accounting --------------
    lanes_c = _round_up(C, 128)                  # minor dim pads to 128 lanes
    pred_row_bytes = lanes_c * itemsize
    side_row_bytes = 128 * 4                     # (tb, 2) f32 -> lane-padded to 128
    per_row_bytes = pred_row_bytes + side_row_bytes

    HARD_CAP = 2048                              # rows; keeps blocks modest on v7x
    MIN_ROWS = 256                               # don't shrink tiles below this
    MIN_TILES = 8                                # keep pipeline / 2 TCs busy

    rows_budget = max(32, (max_block_bytes // per_row_bytes) // 32 * 32)
    tb = min(HARD_CAP, rows_budget)
    rows_for_min_tiles = _round_up(-(-B // MIN_TILES), 32)
    tb = min(tb, max(MIN_ROWS, rows_for_min_tiles))
    if B <= tb:
        tb = B                                   # single full-dim tile (always legal)
    num_tiles = -(-B // tb)

    # ---- merged side array: column 0 = gt (as f32), column 1 = w ------------
    gw = jnp.stack([gt.astype(jnp.float32), w.astype(jnp.float32)], axis=1)  # (B, 2)

    # ---- explicit VMEM limit derived from the double-buffered footprint -----
    pred_block_bytes = _round_up(tb, 32) * lanes_c * itemsize
    side_block_bytes = _round_up(tb, 8) * 128 * 4
    out_block_bytes = 8 * 128 * 4
    footprint = 2 * (pred_block_bytes + side_block_bytes + out_block_bytes)
    vmem_limit = int(min(48 * 1024 * 1024,
                         max(footprint + 4 * 1024 * 1024, 8 * 1024 * 1024)))

    def kernel(pred_ref, gw_ref, out_ref):
        x = pred_ref[...].astype(jnp.float32)                    # (tb, C)
        gw_blk = gw_ref[...]                                      # (tb, 2)
        gt_i = gw_blk[:, 0:1].astype(jnp.int32)                   # (tb, 1)
        w_i = gw_blk[:, 1:2]                                      # (tb, 1)

        # Mask the ragged last tile in-kernel (no HBM pad of the logits).
        row = (jax.lax.broadcasted_iota(jnp.int32, (tb, 1), 0)
               + pl.program_id(0) * tb)
        valid = row < B                                           # (tb, 1) bool
        x = jnp.where(valid, x, 0.0)      # keeps lse finite for garbage rows
        w_i = jnp.where(valid, w_i, 0.0)

        # Numerically stable logsumexp along the class (lane) axis.
        m = jnp.max(x, axis=-1, keepdims=True)
        lse = jnp.log(jnp.sum(jnp.exp(x - m), axis=-1, keepdims=True)) + m

        # Target-logit select folded into one block-wide weighted reduce.
        col = jax.lax.broadcasted_iota(jnp.int32, x.shape, 1)
        partial = (jnp.sum(w_i * lse)
                   - jnp.sum(jnp.where(col == gt_i, w_i * x, 0.0)))

        # Lane-dense unmasked store of the per-tile partial sum.
        out_ref[...] = jnp.broadcast_to(partial, out_ref.shape)

    # TODO(synk): on v7x, sweep pipeline_mode=pl.Buffered(3) on the pred spec.
    # TODO(synk): for vocab-sized C (>= ~32k) tile the class axis with an
    #             online logsumexp; here C fits one lane-aligned block.
    # TODO(synk): for C < 128 (the demo's C=8) a plain XLA fusion would be at
    #             least as fast; the kernel is kept general.
    partials = pl.pallas_call(
        kernel,
        out_shape=jax.ShapeDtypeStruct((num_tiles, 8, 128), jnp.float32),
        grid=(num_tiles,),
        in_specs=[
            pl.BlockSpec((tb, C), lambda i: (i, 0)),
            pl.BlockSpec((tb, 2), lambda i: (i, 0)),
        ],
        out_specs=pl.BlockSpec((1, 8, 128), lambda i: (i, 0, 0)),
        compiler_params=pltpu.CompilerParams(
            dimension_semantics=("parallel",),      # megacore-shardable on v7x
            vmem_limit_bytes=vmem_limit,
        ),
    )(pred, gw)

    # Tiny trailing reduction over the per-tile partial sums.
    return jnp.sum(partials[:, 0, 0]) / B


# ----------------------------------------------------------------------------
# On-device per-sample weight construction (O(B log B), no host round trip)
# ----------------------------------------------------------------------------
def _per_sample_weights(gt, d_target, key):
    """w_i = 0            if class gt_i was randomly dropped (over-represented)
       w_i = 1            if kept under down-sampling (ratio < 1)
       w_i = ratio(gt_i)  if class is under-represented (ratio >= 1)."""
    B = gt.shape[0]
    C = d_target.shape[0]
    gt = gt.astype(jnp.int32)

    counts = jnp.bincount(gt, length=C).astype(jnp.float32)          # (C,)
    present = counts > 0
    c_min = jnp.min(jnp.where(present, counts, jnp.inf))
    d_current = jnp.where(present, counts / c_min, 1.0)
    ratio = jnp.where(present, d_target / d_current, 0.0)            # (C,)

    # O(B log B) within-class random rank: stable sort by (gt, u), then the
    # position inside each class segment == uniform down-sampling rank.
    u = jax.random.uniform(key, (B,))
    order = jnp.lexsort((u, gt))                  # primary gt, secondary u
    sorted_gt = gt[order]
    idx = jnp.arange(B)
    is_start = jnp.concatenate(
        [jnp.ones((1,), dtype=bool), sorted_gt[1:] != sorted_gt[:-1]])
    seg_start = jax.lax.cummax(jnp.where(is_start, idx, 0))
    rank_sorted = (idx - seg_start).astype(jnp.float32)
    rank = jnp.zeros((B,), jnp.float32).at[order].set(rank_sorted)    # (B,)

    ratio_i = ratio[gt]
    keep_k = jnp.floor(counts[gt] * ratio_i)      # int(n_j * ratio_j), truncated
    w = jnp.where(ratio_i < 1.0,
                  (rank < keep_k).astype(jnp.float32),
                  ratio_i)
    return w


@jax.jit
def _dsl_forward(pred, gt, key, d_target):
    w = _per_sample_weights(gt, d_target, key)
    loss = dsl_loss_pallas(pred, gt, w)
    return loss, w


class DSLLossJAX:
    """Mirrors DSL_loss: d_train built from training label counts; forward is a
    class-rebalanced NLL with random down-sampling of over-represented classes."""

    def __init__(self, train_label_counts):
        counts = np.asarray(train_label_counts, dtype=np.float64)
        c_min = counts[counts > 0].min()
        self.d_train = counts / c_min
        self.d_target = self.d_train.copy()
        # TODO(synk): scheduler (.step) only rescales d_target between epochs.

    def __call__(self, pred, gt, key):
        d_target = jnp.asarray(self.d_target, dtype=jnp.float32)
        return _dsl_forward(pred, gt.astype(jnp.int32), key, d_target)


if __name__ == "__main__":
    batch, num_class = 16, 8

    # Synthetic, deterministic "training set" class counts (imbalanced).
    train_label_counts = [40, 20, 10, 10, 10, 10, 10, 10]
    loss_mod = DSLLossJAX(train_label_counts)

    key = jax.random.PRNGKey(0)
    k_pred, k_gt, k_smp = jax.random.split(key, 3)
    pred = jax.random.normal(k_pred, (batch, num_class), dtype=jnp.float32)
    pred = pred.astype(jnp.bfloat16)   # kernel is HBM-bound: stream bf16 logits
    gt = jax.random.randint(k_gt, (batch,), 0, num_class, dtype=jnp.int32)

    loss, w = loss_mod(pred, gt, k_smp)
    loss = jax.block_until_ready(loss)

    # Sanity check against a plain-JAX reference using the same per-sample weights.
    logp = jax.nn.log_softmax(pred.astype(jnp.float32), axis=-1)
    nll = -logp[jnp.arange(batch), gt]
    loss_ref = jnp.sum(w * nll) / batch
    assert np.allclose(np.asarray(loss), np.asarray(loss_ref), rtol=1e-5, atol=1e-5), (
        float(loss), float(loss_ref))

    print("KERNEL_OK")
</pallas_src>

<mosaic_0001>
module attributes {stable_mosaic.version = 11 : i64} {
  func.func private @main(%arg0: i32) attributes {dimension_semantics = [#tpu.dimension_semantics<core_parallel>], iteration_bounds = array<i64: 2>, tpu.core_type = #tpu.core_type<sc_scalar_subcore>, window_params = []} {
    return
  }
}

module attributes {stable_mosaic.version = 11 : i64} {
  func.func private @main(%arg0: i32) attributes {dimension_semantics = [#tpu.dimension_semantics<core_parallel>], iteration_bounds = array<i64: 2>, tpu.core_type = #tpu.core_type<sc_scalar_subcore>, window_params = []} {
    return
  }
}

module attributes {stable_mosaic.version = 11 : i64} {
  func.func @kernel(%arg0: i32, %arg1: memref<16x8xbf16, #tpu.memory_space<vmem>>, %arg2: memref<16x2xf32, #tpu.memory_space<vmem>>, %arg3: memref<1x8x128xf32, #tpu.memory_space<vmem>>) attributes {dimension_semantics = [#tpu.dimension_semantics<parallel>], iteration_bounds = array<i64: 1>, scalar_prefetch = 0 : i64, scratch_operands = 0 : i64, tpu.core_type = #tpu.core_type<tc>, window_params = [{transform_indices = @transform_0, window_bounds = array<i64: 16, 8>}, {transform_indices = @transform_1, window_bounds = array<i64: 16, 2>}, {transform_indices = @transform_2, window_bounds = array<i64: 1, 8, 128>}]} {
    %c0 = arith.constant 0 : index
    %c0_0 = arith.constant 0 : index
    %0 = vector.load %arg1[%c0, %c0_0] : memref<16x8xbf16, #tpu.memory_space<vmem>>, vector<16x8xbf16>
    %1 = arith.extf %0 : vector<16x8xbf16> to vector<16x8xf32>
    %c0_1 = arith.constant 0 : index
    %c0_2 = arith.constant 0 : index
    %2 = vector.load %arg2[%c0_1, %c0_2] : memref<16x2xf32, #tpu.memory_space<vmem>>, vector<16x2xf32>
    %3 = vector.extract_strided_slice %2 {offsets = [0, 0], sizes = [16, 1], strides = [1, 1]} : vector<16x2xf32> to vector<16x1xf32>
    %4 = arith.fptosi %3 : vector<16x1xf32> to vector<16x1xi32>
    %5 = vector.extract_strided_slice %2 {offsets = [0, 1], sizes = [16, 1], strides = [1, 1]} : vector<16x2xf32> to vector<16x1xf32>
    %6 = tpu.iota {dimensions = array<i32: 0>} : vector<16x1xi32>
    %c16_i32 = arith.constant 16 : i32
    %7 = arith.muli %arg0, %c16_i32 : i32
    %8 = vector.broadcast %7 : i32 to vector<16x1xi32>
    %9 = arith.addi %6, %8 : vector<16x1xi32>
    %c16_i32_3 = arith.constant 16 : i32
    %10 = vector.broadcast %c16_i32_3 : i32 to vector<16x1xi32>
    %11 = arith.cmpi slt, %9, %10 : vector<16x1xi32>
    %cst = arith.constant 0.000000e+00 : f32
    %12 = vector.shape_cast %11 : vector<16x1xi1> to vector<16x1xi1>
    %13 = vector.broadcast %12 : vector<16x1xi1> to vector<16x8xi1>
    %14 = vector.broadcast %cst : f32 to vector<16x8xf32>
    %15 = arith.select %13, %1, %14 : vector<16x8xi1>, vector<16x8xf32>
    %cst_4 = arith.constant 0.000000e+00 : f32
    %16 = vector.broadcast %cst_4 : f32 to vector<16x1xf32>
    %17 = arith.select %11, %5, %16 : vector<16x1xi1>, vector<16x1xf32>
    %cst_5 = arith.constant dense<0xFF800000> : vector<16xf32>
    %18 = vector.multi_reduction <maximumf>, %15, %cst_5 [1] : vector<16x8xf32> to vector<16xf32>
    %19 = vector.shape_cast %18 : vector<16xf32> to vector<16x1xf32>
    %20 = vector.broadcast %19 : vector<16x1xf32> to vector<16x8xf32>
    %21 = arith.subf %15, %20 : vector<16x8xf32>
    %22 = math.exp %21 : vector<16x8xf32>
    %cst_6 = arith.constant dense<0.000000e+00> : vector<16xf32>
    %23 = vector.multi_reduction <add>, %22, %cst_6 [1] : vector<16x8xf32> to vector<16xf32>
    %24 = vector.shape_cast %23 : vector<16xf32> to vector<16x1xf32>
    %25 = math.log %24 : vector<16x1xf32>
    %26 = arith.addf %25, %19 : vector<16x1xf32>
    %27 = tpu.iota {dimensions = array<i32: 1>} : vector<16x8xi32>
    %28 = arith.mulf %17, %26 : vector<16x1xf32>
    %29 = vector.shape_cast %28 : vector<16x1xf32> to vector<1x16x1xf32>
    %cst_7 = arith.constant dense<0.000000e+00> : vector<1xf32>
    %30 = vector.multi_reduction <add>, %29, %cst_7 [1, 2] : vector<1x16x1xf32> to vector<1xf32>
    %31 = vector.shape_cast %30 : vector<1xf32> to vector<1x1x1xf32>
    %32 = vector.extract %31[0, 0, 0] : f32 from vector<1x1x1xf32>
    %33 = vector.broadcast %4 : vector<16x1xi32> to vector<16x8xi32>
    %34 = arith.cmpi eq, %27, %33 : vector<16x8xi32>
    %35 = vector.broadcast %17 : vector<16x1xf32> to vector<16x8xf32>
    %36 = arith.mulf %35, %15 : vector<16x8xf32>
    %cst_8 = arith.constant 0.000000e+00 : f32
    %37 = vector.broadcast %cst_8 : f32 to vector<16x8xf32>
    %38 = arith.select %34, %36, %37 : vector<16x8xi1>, vector<16x8xf32>
    %39 = vector.shape_cast %38 : vector<16x8xf32> to vector<1x16x8xf32>
    %cst_9 = arith.constant dense<0.000000e+00> : vector<1xf32>
    %40 = vector.multi_reduction <add>, %39, %cst_9 [1, 2] : vector<1x16x8xf32> to vector<1xf32>
    %41 = vector.shape_cast %40 : vector<1xf32> to vector<1x1x1xf32>
    %42 = vector.extract %41[0, 0, 0] : f32 from vector<1x1x1xf32>
    %43 = arith.subf %32, %42 : f32
    %44 = vector.broadcast %43 : f32 to vector<1x8x128xf32>
    %c0_10 = arith.constant 0 : index
    %c0_11 = arith.constant 0 : index
    %c0_12 = arith.constant 0 : index
    %45 = vector.load %arg3[%c0_10, %c0_11, %c0_12] : memref<1x8x128xf32, #tpu.memory_space<vmem>>, vector<1x8x128xf32>
    tpu.vector_store %arg3[%c0_10, %c0_11, %c0_12], %44 {strides = array<i32>} : memref<1x8x128xf32, #tpu.memory_space<vmem>>, vector<1x8x128xf32>,
    return
  }
  func.func @transform_0(%arg0: i32) -> (i32, i32) {
    %c0_i32 = arith.constant 0 : i32
    %c0_i32_0 = arith.constant 0 : i32
    return %arg0, %c0_i32 : i32, i32
  }
  func.func @transform_1(%arg0: i32) -> (i32, i32) {
    %c0_i32 = arith.constant 0 : i32
    %c0_i32_0 = arith.constant 0 : i32
    return %arg0, %c0_i32 : i32, i32
  }
  func.func @transform_2(%arg0: i32) -> (i32, i32, i32) {
    %c0_i32 = arith.constant 0 : i32
    %c0_i32_0 = arith.constant 0 : i32
    %c0_i32_1 = arith.constant 0 : i32
    return %arg0, %c0_i32, %c0_i32_0 : i32, i32, i32
  }
}

</mosaic_0001>

<bundles_post_ra>
// kernel: _dsl_forward.1
= control target key start
LH: loop header
LB: loop body
LE: loop exit
PB: predicated region body
PF: predicated region fallthrough
CT: control target
= control target key end

     0   :  { %vm36_vm0 = vcmask 64512   ;;  %v153_v5 = vmov 1   ;;  %v154_v21 = vmov 0   ;;  %v61_v25 = vlaneseq  ;;  %s189_s0 = inlined_call_operand.vmem [shape: bf16[16,8], index: 0, kind: input, shape index: {}]   ;;  %s190_s1 = inlined_call_operand.vmem [shape: f32[16,2], index: 1, kind: input, shape index: {}]   ;;  %s191_s2 = inlined_call_operand.vmem [shape: f32[1,8,128], index: 2, kind: output, shape index: {}]  }
   0x1   :  { %v128_v0 = vld [vmem:[%s189_s0] sm:$0xff]   ;;  %143 = vset.pattern.permute.xlu1 %v153_v5  ;;  %142 = vset.pattern.permute.xlu0 %v153_v5  ;;  %v16_v17 = vld [vmem:[%s190_s1 + $0x8] sm:$0xff]  ;;  %vm73_vm3 = vcmask 7168  }
   0x2   :  { %v129_v1 = vunpack.c.l.bf16 %v128_v0  ;;  %v130_v2 = vunpack.c.h.bf16 %v128_v0  ;;  %v15_v6 = vld [vmem:[%s190_s1] sm:$0xff]  ;;  %v133_v19 = vtrunc.f32 %v16_v17  ;;  %v62_v28 = vand.u32 127, %v61_v25  ;;  %s155_s1 = smov 127  }
   0x3   :  { %v131_v18 = vtrunc.f32 %v15_v6 }
   0x4   :  { %v37_v3 = vsel %vm36_vm0, %v129_v1, -inf  ;;  %v40_v4 = vsel %vm36_vm0, %v130_v2, -inf  ;;  %v134_v22 = vcvt.f32.s32 %v133_v19 }
   0x5   :  { %38 = vmax.xlane.f32.xlu0 %v37_v3  ;;  %v132_v20 = vcvt.f32.s32 %v131_v18 }
   0x9   :  { %41 = vmax.xlane.f32.xlu0 %v40_v4 }
  0x1f   :  { %96 = vperm.xlu0 %142, %v15_v6  }
  0x92   :  { %v39_v7 = vpop.xlane.xlu0 %38 }
  0x93   :  { %v43_v8 = vsub.f32 %v129_v1, %v39_v7 }
  0x95   :  { %v45_v9 = vmul.f32 1.442695, %v43_v8 }
  0x96   :  { %v42_v10 = vpop.xlane.xlu0 %41 }
  0x97   :  { %145 = vpow2.f32 %v45_v9  ;;  %v44_v11 = vsub.f32 %v130_v2, %v42_v10 }
  0x99   :  { %v47_v12 = vmul.f32 1.442695, %v44_v11 }
  0x9b   :  { %147 = vpow2.f32 %v47_v12 }
  0x9e   :  { %v97_v26 = vpop.permute.xlu0 %96 }
  0x9f   :  { %v104_v29 = vmul.f32 %v129_v1, %v97_v26 }
  0xa1   :  { %v146_v13 = vpop.eup %145 }
  0xa2   :  { %v49_v14 = vsel %vm36_vm0, %v146_v13, 0.0 }
  0xa3   :  { %50 = vadd.xlane.f32.xlu1 %v49_v14 }
  0xa5   :  { %v148_v15 = vpop.eup %147 }
  0xa6   :  { %v52_v16 = vsel %vm36_vm0, %v148_v15, 0.0 }
  0xa7   :  { %53 = vadd.xlane.f32.xlu1 %v52_v16 }
  0xb8   :  { %101 = vperm.xlu1 %143, %v16_v17  }
  0xbc   :  { %144 = vset.pattern.permute.xlu1 %v154_v21 }
  0xbd   :  { %87 = vperm.xlu1 %144, %v132_v20  }
  0xc1   :  { %90 = vperm.xlu1 %144, %v134_v22  }
 0x130   :  { %v51_v23 = vpop.xlane.xlu1 %50 }
 0x131   :  { %149 = vlog2.f32 %v51_v23 }
 0x134   :  { %v54_v24 = vpop.xlane.xlu1 %53 }
 0x135   :  { %151 = vlog2.f32 %v54_v24 }
 0x138   :  { %v102_v27 = vpop.permute.xlu1 %101 }
 0x139   :  { %v105_v34 = vmul.f32 %v130_v2, %v102_v27 }
 0x13b   :  { %v150_v30 = vpop.eup %149 }
 0x13c   :  { %v56_v31 = vmul.f32 0.6931472, %v150_v30  ;;  %v88_v32 = vpop.permute.xlu1 %87 }
 0x13d   :  { %vm92_vm1 = vcmp.eq.s32.totalorder %v62_v28, %v88_v32 }
 0x13e   :  { %v59_v33 = vadd.f32 %v56_v31, %v39_v7  ;;  %v106_v35 = vsel %vm92_vm1, %v104_v29, 0.0 }
 0x13f   :  { %v152_v36 = vpop.eup %151  ;;  %v108_v40 = vsel %vm36_vm0, %v106_v35, 0.0 }
 0x140   :  { %v58_v37 = vmul.f32 0.6931472, %v152_v36  ;;  %v63_v38 = vmul.f32 %v59_v33, %v15_v6  ;;  %v91_v39 = vpop.permute.xlu1 %90 }
 0x141   :  { %vm93_vm2 = vcmp.eq.s32.totalorder %v62_v28, %v91_v39 }
 0x142   :  { %v60_v41 = vadd.f32 %v58_v37, %v42_v10  ;;  %67 = vrot.lane.b32.xlu1 %v63_v38, %s155_s1  ;;  %v107_v42 = vsel %vm93_vm2, %v105_v34, 0.0 }
 0x143   :  { %v109_v43 = vsel %vm36_vm0, %v107_v42, 0.0 }
 0x144   :  { %v64_v44 = vmul.f32 %v60_v41, %v16_v17  ;;  %v110_v45 = vadd.f32 %v109_v43, %v108_v40 }
 0x146   :  { %69 = vrot.lane.b32.xlu1 %v64_v44, %s155_s1  ;;  %111 = vadd.xlane.f32.xlu0 %v110_v45 }
 0x1b4   :  { %v68_v46 = vpop.permute.xlu1 %67 }
 0x1b5   :  { %v74_v48 = vsel %vm73_vm3, %v68_v46, 0.0 }
 0x1b8   :  { %v70_v47 = vpop.permute.xlu1 %69 }
 0x1b9   :  { %v75_v49 = vsel %vm73_vm3, %v70_v47, 0.0 }
 0x1ba   :  { %v76_v50 = vadd.f32 %v75_v49, %v74_v48 }
 0x1bc   :  { %77 = vadd.xlane.f32.xlu1 %v76_v50 }
 0x1d3   :  { %v112_v51 = vpop.xlane.xlu0 %111 }
 0x1d4   :  { %v113_v52 = vrot.slane %v112_v51, 4 }
 0x1d6   :  { %v114_v53 = vadd.f32 %v113_v52, %v112_v51 }
 0x1d8   :  { %v115_v54 = vrot.slane %v114_v53, 2 }
 0x1da   :  { %v116_v58 = vadd.f32 %v115_v54, %v114_v53 }
 0x1dc   :  { %v117_v61 = vrot.slane %v116_v58, 1 }
 0x1de   :  { %v118_v0 = vadd.f32 %v117_v61, %v116_v58 }
 0x249   :  { %v78_v55 = vpop.xlane.xlu1 %77 }
 0x24a   :  { %v79_v56 = vrot.slane %v78_v55, 4 }
 0x24c   :  { %v80_v57 = vadd.f32 %v79_v56, %v78_v55 }
 0x24e   :  { %v81_v59 = vrot.slane %v80_v57, 2 }
 0x250   :  { %v82_v60 = vadd.f32 %v81_v59, %v80_v57 }
 0x252   :  { %v83_v62 = vrot.slane %v82_v60, 1 }
 0x254   :  { %v84_v63 = vadd.f32 %v83_v62, %v82_v60 }
 0x256   :  { %135 = vpush %v84_v63 }
 0x257   :  { %137 = vpush %v118_v0 }
 0x287   :  { %s136_s14 = spop %135 }
 0x288   :  { %s138_s15 = spop %137 }
 0x289   :  { %s120_s16 = ssub.f32 %s136_s14, %s138_s15 }
 0x28b   :  { %v121_v1 = vstv %s120_s16 }
 0x28c   :  { %122 = vst [vmem:[%s191_s2] sm:$0xff] %v121_v1 }

</bundles_post_ra>
